<compile_context>
chip_gen: v7x
topology: tpu7x:2x2x1
jax: 0.10.0
libtpu: 0.0.40
codegen_flags: <defaults>
</compile_context>

<pallas_src>
import jax
import jax.numpy as jnp
from jax.experimental import pallas as pl
from jax.experimental.pallas import tpu as pltpu


def dmf_kernel(u_in_ref, i_in_ref, uw_ref, ub_ref, iw_ref, ib_ref,
               fw2_ref, fb_ref, out_ref):
    # Fused user tower: ReLU(u @ Wu + bu)       bf16 matmul, f32 accumulate
    user_vec = jnp.maximum(
        jnp.dot(u_in_ref[...], uw_ref[...],
                preferred_element_type=jnp.float32) + ub_ref[...], 0.0)      # (TB, 32)
    # Fused item tower: ReLU(v @ Wi + bi)
    item_vec = jnp.maximum(
        jnp.dot(i_in_ref[...], iw_ref[...],
                preferred_element_type=jnp.float32) + ib_ref[...], 0.0)      # (TB, 32)

    # Final Linear(1024, 1) over the flattened outer product as a bilinear form:
    #   y[b] = userVec[b] @ W2 @ itemVec[b]^T + fb
    t = jnp.dot(user_vec, fw2_ref[...], preferred_element_type=jnp.float32)  # (TB, 32)
    y = jnp.sum(t * item_vec, axis=-1, keepdims=True) + fb_ref[0, 0]         # (TB, 1)

    out_ref[...] = jax.nn.sigmoid(y)


def _round_up(x, m):
    return (x + m - 1) // m * m


def dmf_forward(user, item, params, user_matrix, item_matrix, *, max_tb=512):
    uw0, ub0, uw1, ub1, iw0, ib0, iw1, ib1, fw, fb = params
    nItems = user_matrix.shape[1]
    nUsers = item_matrix.shape[1]
    B = user.shape[0]

    # ---- parameter prep (wrapper-side layout plumbing) ----
    # Fuse the two activation-free Linears per tower and pre-transpose so the
    # kernel never transposes a weight.
    u_w = (uw1 @ uw0).T.astype(jnp.bfloat16)            # (nItems, 32)
    u_b = (ub0 @ uw1.T + ub1).reshape(1, 32)            # f32
    i_w = (iw1 @ iw0).T.astype(jnp.bfloat16)            # (nUsers, 32)
    i_b = (ib0 @ iw1.T + ib1).reshape(1, 32)            # f32
    fw2 = fw.reshape(32, 32)                            # row-major [user_dim, item_dim]
    fb2 = fb.reshape(1, 1)

    # ---- batch tiling (MXU-friendly, VMEM-budgeted for v7x's 64 MiB) ----
    TB = min(max_tb, _round_up(B, 128))

    def vmem_need(tb):
        inputs = 2 * 2 * tb * (nItems + nUsers) * 2     # 2-deep pipeline, bf16 tiles
        weights = (nItems + nUsers) * 32 * 2 + 32 * 32 * 4 + 2 * 32 * 4
        return inputs + weights + 2 * tb * 4

    while TB > 128 and vmem_need(TB) > 40 * 1024 * 1024:
        TB //= 2
    B_pad = _round_up(B, TB)
    vmem_limit = int(min(64 * 1024 * 1024,
                         max(32 * 1024 * 1024, 2 * vmem_need(TB))))

    # ---- embedding-row gather (bf16 cast fuses into the XLA gather) ----
    user_input = jnp.take(user_matrix, user, axis=0).astype(jnp.bfloat16)   # (B, nItems)
    item_input = jnp.take(item_matrix, item, axis=0).astype(jnp.bfloat16)   # (B, nUsers)
    if B_pad != B:
        user_input = jnp.pad(user_input, ((0, B_pad - B), (0, 0)))
        item_input = jnp.pad(item_input, ((0, B_pad - B), (0, 0)))

    grid = (B_pad // TB,)
    out = pl.pallas_call(
        dmf_kernel,
        out_shape=jax.ShapeDtypeStruct((B_pad, 1), jnp.float32),
        grid_spec=pltpu.PrefetchScalarGridSpec(
            num_scalar_prefetch=0,
            grid=grid,
            in_specs=[
                pl.BlockSpec((TB, nItems), lambda i: (i, 0)),        # user rows (bf16)
                pl.BlockSpec((TB, nUsers), lambda i: (i, 0)),        # item rows (bf16)
                pl.BlockSpec((nItems, 32), lambda i: (0, 0)),        # fused user W
                pl.BlockSpec((1, 32), lambda i: (0, 0)),             # fused user b
                pl.BlockSpec((nUsers, 32), lambda i: (0, 0)),        # fused item W
                pl.BlockSpec((1, 32), lambda i: (0, 0)),             # fused item b
                pl.BlockSpec((32, 32), lambda i: (0, 0)),            # final W as 32x32
                pl.BlockSpec((1, 1), lambda i: (0, 0),
                             memory_space=pltpu.MemorySpace.SMEM),   # final bias scalar
            ],
            out_specs=pl.BlockSpec((TB, 1), lambda i: (i, 0)),
        ),
        compiler_params=pltpu.CompilerParams(
            dimension_semantics=("parallel",),
            vmem_limit_bytes=vmem_limit,
        ),
    )(user_input, item_input, u_w, u_b, i_w, i_b, fw2, fb2)
    return out[:B, 0]


def dmf_reference(user, item, params, user_matrix, item_matrix):
    uw0, ub0, uw1, ub1, iw0, ib0, iw1, ib1, fw, fb = params
    u = jnp.take(user_matrix, user, axis=0)
    v = jnp.take(item_matrix, item, axis=0)
    uh = u @ uw0.T + ub0
    uh = jnp.maximum(uh @ uw1.T + ub1, 0.0)
    vh = v @ iw0.T + ib0
    vh = jnp.maximum(vh @ iw1.T + ib1, 0.0)
    inter = jnp.einsum('bi,bj->bij', uh, vh).reshape(u.shape[0], 1024)
    y = inter @ fw.T + fb
    return jax.nn.sigmoid(y.reshape(-1))


if __name__ == "__main__":
    # Small but consistent shapes: userLayers = itemLayers = [64, 32]
    # (last layer must be 32 so the 32x32 interaction map flattens to 1024).
    B = 8
    nUsers, nItems = 64, 64
    H, OUT = 64, 32

    key = jax.random.PRNGKey(0)
    ks = jax.random.split(key, 14)

    user_matrix = jax.random.normal(ks[0], (nUsers, nItems), jnp.float32)
    item_matrix = jax.random.normal(ks[1], (nItems, nUsers), jnp.float32)

    def lin(kw, kb, out_dim, in_dim):
        bound = 1.0 / jnp.sqrt(in_dim)
        w = jax.random.uniform(kw, (out_dim, in_dim), jnp.float32, -bound, bound)
        b = jax.random.uniform(kb, (out_dim,), jnp.float32, -bound, bound)
        return w, b

    uw0, ub0 = lin(ks[2], ks[3], H, nItems)      # userModel Linear(nItems, 64)
    uw1, ub1 = lin(ks[4], ks[5], OUT, H)         # userModel Linear(64, 32)
    iw0, ib0 = lin(ks[6], ks[7], H, nUsers)      # itemModel Linear(nUsers, 64)
    iw1, ib1 = lin(ks[8], ks[9], OUT, H)         # itemModel Linear(64, 32)
    fw, fb = lin(ks[10], ks[11], 1, 1024)        # final Linear(1024, 1)
    params = (uw0, ub0, uw1, ub1, iw0, ib0, iw1, ib1, fw, fb)

    user_idx = jax.random.randint(ks[12], (B,), 0, nUsers)
    item_idx = jax.random.randint(ks[13], (B,), 0, nItems)

    y = dmf_forward(user_idx, item_idx, params, user_matrix, item_matrix)
    y = jax.block_until_ready(y)

    y_ref = dmf_reference(user_idx, item_idx, params, user_matrix, item_matrix)
    assert y.shape == (B,)
    # bf16 inputs/weights in the kernel vs. full-f32 reference -> slightly looser tol.
    assert jnp.allclose(y, y_ref, rtol=2e-2, atol=2e-2), (y, y_ref)

    print("KERNEL_OK")
</pallas_src>

<mosaic_0001>
module attributes {stable_mosaic.version = 11 : i64} {
  func.func @dmf_kernel(%arg0: i32, %arg1: memref<128x64xbf16, #tpu.memory_space<vmem>>, %arg2: memref<128x64xbf16, #tpu.memory_space<vmem>>, %arg3: memref<64x32xbf16, #tpu.memory_space<vmem>>, %arg4: memref<1x32xf32, #tpu.memory_space<vmem>>, %arg5: memref<64x32xbf16, #tpu.memory_space<vmem>>, %arg6: memref<1x32xf32, #tpu.memory_space<vmem>>, %arg7: memref<32x32xf32, #tpu.memory_space<vmem>>, %arg8: memref<1x1xf32, #tpu.memory_space<smem>>, %arg9: memref<128x1xf32, #tpu.memory_space<vmem>>) attributes {dimension_semantics = [#tpu.dimension_semantics<parallel>], iteration_bounds = array<i64: 1>, scalar_prefetch = 0 : i64, scratch_operands = 0 : i64, tpu.core_type = #tpu.core_type<tc>, window_params = [{transform_indices = @transform_0, window_bounds = array<i64: 128, 64>}, {transform_indices = @transform_1, window_bounds = array<i64: 128, 64>}, {pipeline_mode = #tpu.pipeline_mode<synchronous>, transform_indices = @transform_2, window_bounds = array<i64: 64, 32>}, {pipeline_mode = #tpu.pipeline_mode<synchronous>, transform_indices = @transform_3, window_bounds = array<i64: 1, 32>}, {pipeline_mode = #tpu.pipeline_mode<synchronous>, transform_indices = @transform_4, window_bounds = array<i64: 64, 32>}, {pipeline_mode = #tpu.pipeline_mode<synchronous>, transform_indices = @transform_5, window_bounds = array<i64: 1, 32>}, {pipeline_mode = #tpu.pipeline_mode<synchronous>, transform_indices = @transform_6, window_bounds = array<i64: 32, 32>}, {transform_indices = @transform_7, window_bounds = array<i64: 1, 1>}, {transform_indices = @transform_8, window_bounds = array<i64: 128, 1>}]} {
    %c0 = arith.constant 0 : index
    %c0_0 = arith.constant 0 : index
    %0 = vector.load %arg1[%c0, %c0_0] : memref<128x64xbf16, #tpu.memory_space<vmem>>, vector<128x64xbf16>
    %c0_1 = arith.constant 0 : index
    %c0_2 = arith.constant 0 : index
    %1 = vector.load %arg3[%c0_1, %c0_2] : memref<64x32xbf16, #tpu.memory_space<vmem>>, vector<64x32xbf16>
    %cst = arith.constant dense<0.000000e+00> : vector<128x32xf32>
    %2 = tpu.matmul %0, %1, %cst {dimension_numbers = #tpu.dot_dimension_numbers<[1], [0], [0], [1], [0, 0, 1, 1], [], []>} : vector<128x64xbf16>, vector<64x32xbf16>, vector<128x32xf32> -> vector<128x32xf32>
    %c0_3 = arith.constant 0 : index
    %c0_4 = arith.constant 0 : index
    %3 = vector.load %arg4[%c0_3, %c0_4] : memref<1x32xf32, #tpu.memory_space<vmem>>, vector<1x32xf32>
    %4 = vector.broadcast %3 : vector<1x32xf32> to vector<128x32xf32>
    %5 = arith.addf %2, %4 : vector<128x32xf32>
    %cst_5 = arith.constant 0.000000e+00 : f32
    %6 = vector.broadcast %cst_5 : f32 to vector<128x32xf32>
    %7 = arith.maximumf %5, %6 : vector<128x32xf32>
    %c0_6 = arith.constant 0 : index
    %c0_7 = arith.constant 0 : index
    %8 = vector.load %arg2[%c0_6, %c0_7] : memref<128x64xbf16, #tpu.memory_space<vmem>>, vector<128x64xbf16>
    %c0_8 = arith.constant 0 : index
    %c0_9 = arith.constant 0 : index
    %9 = vector.load %arg5[%c0_8, %c0_9] : memref<64x32xbf16, #tpu.memory_space<vmem>>, vector<64x32xbf16>
    %cst_10 = arith.constant dense<0.000000e+00> : vector<128x32xf32>
    %10 = tpu.matmul %8, %9, %cst_10 {dimension_numbers = #tpu.dot_dimension_numbers<[1], [0], [0], [1], [0, 0, 1, 1], [], []>} : vector<128x64xbf16>, vector<64x32xbf16>, vector<128x32xf32> -> vector<128x32xf32>
    %c0_11 = arith.constant 0 : index
    %c0_12 = arith.constant 0 : index
    %11 = vector.load %arg6[%c0_11, %c0_12] : memref<1x32xf32, #tpu.memory_space<vmem>>, vector<1x32xf32>
    %12 = vector.broadcast %11 : vector<1x32xf32> to vector<128x32xf32>
    %13 = arith.addf %10, %12 : vector<128x32xf32>
    %cst_13 = arith.constant 0.000000e+00 : f32
    %14 = vector.broadcast %cst_13 : f32 to vector<128x32xf32>
    %15 = arith.maximumf %13, %14 : vector<128x32xf32>
    %c0_14 = arith.constant 0 : index
    %c0_15 = arith.constant 0 : index
    %16 = vector.load %arg7[%c0_14, %c0_15] : memref<32x32xf32, #tpu.memory_space<vmem>>, vector<32x32xf32>
    %cst_16 = arith.constant dense<0.000000e+00> : vector<128x32xf32>
    %17 = tpu.matmul %7, %16, %cst_16 {dimension_numbers = #tpu.dot_dimension_numbers<[1], [0], [0], [1], [0, 0, 1, 1], [], []>} : vector<128x32xf32>, vector<32x32xf32>, vector<128x32xf32> -> vector<128x32xf32>
    %18 = arith.mulf %17, %15 : vector<128x32xf32>
    %cst_17 = arith.constant dense<0.000000e+00> : vector<128xf32>
    %19 = vector.multi_reduction <add>, %18, %cst_17 [1] : vector<128x32xf32> to vector<128xf32>
    %20 = vector.shape_cast %19 : vector<128xf32> to vector<128x1xf32>
    %c0_18 = arith.constant 0 : index
    %c0_19 = arith.constant 0 : index
    %21 = memref.load %arg8[%c0_18, %c0_19] : memref<1x1xf32, #tpu.memory_space<smem>>
    %22 = vector.broadcast %21 : f32 to vector<128x1xf32>
    %23 = arith.addf %20, %22 : vector<128x1xf32>
    %24 = arith.negf %23 : vector<128x1xf32>
    %25 = math.exp %24 : vector<128x1xf32>
    %cst_20 = arith.constant 1.000000e+00 : f32
    %26 = vector.broadcast %cst_20 : f32 to vector<128x1xf32>
    %27 = arith.addf %26, %25 : vector<128x1xf32>
    %28 = arith.divf %26, %27 : vector<128x1xf32>
    %c0_21 = arith.constant 0 : index
    %c0_22 = arith.constant 0 : index
    %29 = vector.load %arg9[%c0_21, %c0_22] : memref<128x1xf32, #tpu.memory_space<vmem>>, vector<128x1xf32>
    tpu.vector_store %arg9[%c0_21, %c0_22], %28 {strides = array<i32>} : memref<128x1xf32, #tpu.memory_space<vmem>>, vector<128x1xf32>,
    return
  }
  func.func @transform_0(%arg0: i32) -> (i32, i32) {
    %c0_i32 = arith.constant 0 : i32
    %c0_i32_0 = arith.constant 0 : i32
    return %arg0, %c0_i32 : i32, i32
  }
  func.func @transform_1(%arg0: i32) -> (i32, i32) {
    %c0_i32 = arith.constant 0 : i32
    %c0_i32_0 = arith.constant 0 : i32
    return %arg0, %c0_i32 : i32, i32
  }
  func.func @transform_2(%arg0: i32) -> (i32, i32) {
    %c0_i32 = arith.constant 0 : i32
    %c0_i32_0 = arith.constant 0 : i32
    %c0_i32_1 = arith.constant 0 : i32
    return %c0_i32, %c0_i32_0 : i32, i32
  }
  func.func @transform_3(%arg0: i32) -> (i32, i32) {
    %c0_i32 = arith.constant 0 : i32
    %c0_i32_0 = arith.constant 0 : i32
    %c0_i32_1 = arith.constant 0 : i32
    return %c0_i32, %c0_i32_0 : i32, i32
  }
  func.func @transform_4(%arg0: i32) -> (i32, i32) {
    %c0_i32 = arith.constant 0 : i32
    %c0_i32_0 = arith.constant 0 : i32
    %c0_i32_1 = arith.constant 0 : i32
    return %c0_i32, %c0_i32_0 : i32, i32
  }
  func.func @transform_5(%arg0: i32) -> (i32, i32) {
    %c0_i32 = arith.constant 0 : i32
    %c0_i32_0 = arith.constant 0 : i32
    %c0_i32_1 = arith.constant 0 : i32
    return %c0_i32, %c0_i32_0 : i32, i32
  }
  func.func @transform_6(%arg0: i32) -> (i32, i32) {
    %c0_i32 = arith.constant 0 : i32
    %c0_i32_0 = arith.constant 0 : i32
    %c0_i32_1 = arith.constant 0 : i32
    return %c0_i32, %c0_i32_0 : i32, i32
  }
  func.func @transform_7(%arg0: i32) -> (i32, i32) {
    %c0_i32 = arith.constant 0 : i32
    %c0_i32_0 = arith.constant 0 : i32
    %c0_i32_1 = arith.constant 0 : i32
    return %c0_i32, %c0_i32_0 : i32, i32
  }
  func.func @transform_8(%arg0: i32) -> (i32, i32) {
    %c0_i32 = arith.constant 0 : i32
    %c0_i32_0 = arith.constant 0 : i32
    return %arg0, %c0_i32 : i32, i32
  }
}

</mosaic_0001>

<bundles_post_ra>
// kernel: tpu_custom_call.1
= control target key start
LH: loop header
LB: loop body
LE: loop exit
PB: predicated region body
PF: predicated region fallthrough
CT: control target
= control target key end

     0   :  { %vm126_vm0 = vcmask 523264   ;;  %vm500_vm1 = vcmask 261120   ;;  %vm872_vm2 = vcmask 7168   ;;  %s1487_s2 = inlined_call_operand.vmem [shape: bf16[64,32], index: 2, kind: input, shape index: {}]   ;;  %s1488_s0 = inlined_call_operand.vmem [shape: bf16[128,64], index: 0, kind: input, shape index: {}]   ;;  %s1489_s4 = inlined_call_operand.vmem [shape: bf16[64,32], index: 4, kind: input, shape index: {}]   ;;  %s1490_s6 = inlined_call_operand.vmem [shape: f32[32,32], index: 6, kind: input, shape index: {}]   ;;  %s1491_s1 = inlined_call_operand.vmem [shape: bf16[128,64], index: 1, kind: input, shape index: {}]   ;;  %s1492_s3 = inlined_call_operand.vmem [shape: f32[1,32], index: 3, kind: input, shape index: {}]   ;;  %s1493_s5 = inlined_call_operand.vmem [shape: f32[1,32], index: 5, kind: input, shape index: {}]   ;;  %s1494_s7 = inlined_call_operand.<no memory space> [shape: f32[1,1], index: 7, kind: input, shape index: {}]   ;;  %s1495_s8 = inlined_call_operand.vmem [shape: f32[128,1], index: 8, kind: output, shape index: {}]  }
   0x1   :  { %v1107_v0 = vld [vmem:[%s1487_s2] sm:$0xff]   ;;  %v1108_v1 = vld [vmem:[%s1487_s2 + $0x8] sm:$0xff]   ;;  %v1109_v2 = vld [vmem:[%s1487_s2 + $0x10] sm:$0xff]  }
   0x2   :  { %1011 = vmatprep.subr.bf16.mxu0 %v1107_v0  ;;  %1099 = vmatprep.subr.bf16.mxu1 %v1107_v0  ;;  %v1111_v3 = vld [vmem:[%s1488_s0] sm:$0xff]   ;;  %v1110_v4 = vld [vmem:[%s1487_s2 + $0x18] sm:$0xff]   ;;  %v1112_v6 = vld [vmem:[%s1488_s0 + $0x8] sm:$0xff]  }
   0x3   :  { %1012 = vmatpush3.bf16.msra.mxu0 %v1107_v0  ;;  %1103 = vmatpush3.bf16.msra.mxu1 %v1107_v0  ;;  %v1115_v5 = vld [vmem:[%s1488_s0 + $0x20] sm:$0xff]   ;;  %v1113_v8 = vld [vmem:[%s1488_s0 + $0x10] sm:$0xff]   ;;  %v1116_v9 = vld [vmem:[%s1488_s0 + $0x28] sm:$0xff]  }
   0x4   :  { %1013 = vmatprep.subr.bf16.mxu0 %v1108_v1  ;;  %1100 = vmatprep.subr.bf16.mxu1 %v1108_v1  ;;  %v1119_v7 = vld [vmem:[%s1489_s4] sm:$0xff]   ;;  %v497_v11 = vld [vmem:[%s1490_s6 + $0x8] sm:$0xff]  ;;  %v1117_v12 = vld [vmem:[%s1488_s0 + $0x30] sm:$0xff]  }
   0x5   :  { %1019 = vmatprep.mubr.msk.bf16.mxu0 %vm126_vm0, %v1111_v3  ;;  %1027 = vmatprep.mubr.msk.bf16.mxu1 %vm126_vm0, %v1115_v5  ;;  %v496_v10 = vld [vmem:[%s1490_s6] sm:$0xff]  ;;  %v498_v14 = vld [vmem:[%s1490_s6 + $0x10] sm:$0xff]  ;;  %v1120_v15 = vld [vmem:[%s1489_s4 + $0x8] sm:$0xff]  }
   0x6   :  { %v1091_v13 = vpack.c.bf16 %v497_v11, %v496_v10  ;;  %v499_v16 = vld [vmem:[%s1490_s6 + $0x18] sm:$0xff]  ;;  %v1121_v18 = vld [vmem:[%s1489_s4 + $0x10] sm:$0xff]   ;;  %v1123_v22 = vld [vmem:[%s1491_s1] sm:$0xff]  }
   0x7   :  { %1014 = vmatpush3.bf16.msra.mxu0 %v1108_v1  ;;  %1104 = vmatpush3.bf16.msra.mxu1 %v1108_v1  ;;  %v1095_v17 = vpack.c.bf16 %v499_v16, %v498_v14  ;;  %v1114_v19 = vld [vmem:[%s1488_s0 + $0x18] sm:$0xff]   ;;  %v1124_v23 = vld [vmem:[%s1491_s1 + $0x8] sm:$0xff]   ;;  %v1125_v24 = vld [vmem:[%s1491_s1 + $0x10] sm:$0xff]  }
   0x8   :  { %1015 = vmatprep.subr.bf16.mxu0 %v1109_v2  ;;  %1101 = vmatprep.subr.bf16.mxu1 %v1109_v2  ;;  %v1118_v20 = vld [vmem:[%s1488_s0 + $0x38] sm:$0xff]   ;;  %v1127_v26 = vld [vmem:[%s1491_s1 + $0x20] sm:$0xff]   ;;  %v1128_v27 = vld [vmem:[%s1491_s1 + $0x28] sm:$0xff]  }
   0x9   :  { %v1122_v21 = vld [vmem:[%s1489_s4 + $0x18] sm:$0xff]   ;;  %v1129_v28 = vld [vmem:[%s1491_s1 + $0x30] sm:$0xff]   ;;  %v893_v30 = vld [vmem:[%s1492_s3] ss:$0 sm:$0xff] }
   0xa   :  { %v1126_v25 = vld [vmem:[%s1491_s1 + $0x18] sm:$0xff]  }
   0xb   :  { %1016 = vmatpush3.bf16.msra.mxu0 %v1109_v2  ;;  %1105 = vmatpush3.bf16.msra.mxu1 %v1109_v2  ;;  %v1130_v29 = vld [vmem:[%s1491_s1 + $0x38] sm:$0xff]  }
   0xc   :  { %1017 = vmatprep.subr.bf16.mxu0 %v1110_v4  ;;  %1102 = vmatprep.subr.bf16.mxu1 %v1110_v4 }
   0xf   :  { %1018 = vmatpush3.bf16.msra.mxu0 %v1110_v4  ;;  %1106 = vmatpush3.bf16.msra.mxu1 %v1110_v4 }
  0x10   :  { %1035 = vmatprep.subr.bf16.mxu1 %v1119_v7  ;;  %1092 = vmatprep.subr.bf16.mxu0 %v1091_v13 }
  0x12   :  { %1020 = vmatmul.mubr.msk.bf16.vlgmr.msra.gmra.mrb[0].mxu0 %vm126_vm0, %v1112_v6  ;;  %1028 = vmatmul.mubr.msk.bf16.vlgmr.msra.gmra.mrb[0].mxu1 %vm126_vm0, %v1116_v9 }
  0x13   :  { %1023 = vmatprep.mubr.msk.bf16.mxu0 %vm126_vm0, %v1113_v8  ;;  %1031 = vmatprep.mubr.msk.bf16.mxu1 %vm126_vm0, %v1117_v12 }
  0x14   :  { %1036 = vmatpush3.bf16.msra.mxu1 %v1119_v7  ;;  %1094 = vmatpush3.bf16.msra.mxu0 %v1091_v13 }
  0x15   :  { %1037 = vmatprep.subr.bf16.mxu1 %v1120_v15  ;;  %1096 = vmatprep.subr.bf16.mxu0 %v1095_v17 }
  0x18   :  { %1038 = vmatpush3.bf16.msra.mxu1 %v1120_v15  ;;  %1098 = vmatpush3.bf16.msra.mxu0 %v1095_v17 }
  0x19   :  { %1039 = vmatprep.subr.bf16.mxu1 %v1121_v18 }
  0x1a   :  { %1024 = vmatmul.mubr.msk.bf16.gmra.mrb[4].mxu0 %vm126_vm0, %v1114_v19  ;;  %1032 = vmatmul.mubr.msk.bf16.gmra.mrb[4].mxu1 %vm126_vm0, %v1118_v20 }
  0x1b   :  { %1043 = vmatprep.mubr.msk.bf16.mxu1 %vm126_vm0, %v1123_v22 }
  0x1c   :  { %1040 = vmatpush3.bf16.msra.mxu1 %v1121_v18 }
  0x1d   :  { %1041 = vmatprep.subr.bf16.mxu1 %v1122_v21 }
  0x20   :  { %1042 = vmatpush3.bf16.msra.mxu1 %v1122_v21 }
  0x23   :  { %1044 = vmatmul.mubr.msk.bf16.vlgmr.msra.gmra.mrb[8].mxu1 %vm126_vm0, %v1124_v23 }
  0x24   :  { %1047 = vmatprep.mubr.msk.bf16.mxu1 %vm126_vm0, %v1125_v24 }
  0x2b   :  { %1048 = vmatmul.mubr.msk.bf16.gmra.mrb[12].mxu1 %vm126_vm0, %v1126_v25 }
  0x2c   :  { %1051 = vmatprep.mubr.msk.bf16.mxu1 %vm126_vm0, %v1127_v26 }
  0x33   :  { %1052 = vmatmul.mubr.msk.bf16.gmra.mrb[16].mxu1 %vm126_vm0, %v1128_v27 }
  0x34   :  { %1055 = vmatprep.mubr.msk.bf16.mxu1 %vm126_vm0, %v1129_v28 }
  0x3b   :  { %1056 = vmatmul.mubr.msk.bf16.gmra.mrb[20].mxu1 %vm126_vm0, %v1130_v29 }
  0xe5   :  { %v1021_v31 = vpop.f32.mrb[0].mxu0  ;;  %v1029_v32 = vpop.f32.mrb[0].mxu1 }
  0xe6   :  { %v185_v33 = vpop.f32.mrb[1].mxu0  ;;  %v217_v34 = vpop.f32.mrb[1].mxu1  ;;  %v194_v38 = vadd.f32 %v1021_v31, %v893_v30  ;;  %v226_v0 = vadd.f32 %v1029_v32, %v893_v30  ;;  %v1366_v31 = vld [vmem:[%s1493_s5] ss:$0 sm:$0xff] }
  0xe7   :  { %v186_v35 = vadd.f32 %v893_v30, %v185_v33  ;;  %v1022_v36 = vpop.f32.mrb[2].mxu0  ;;  %v1030_v37 = vpop.f32.mrb[2].mxu1  ;;  %v218_v60 = vadd.f32 %v893_v30, %v217_v34 }
  0xe8   :  { %v188_v39 = vpop.f32.mrb[3].mxu0  ;;  %v220_v40 = vpop.f32.mrb[3].mxu1  ;;  %v197_v43 = vadd.f32 %v1022_v36, %v893_v30  ;;  %v250_v45 = vmax.f32 %v194_v38, 0.0  ;;  %v258_v4 = vmax.f32 %v226_v0, 0.0  ;;  %v229_v6 = vadd.f32 %v1030_v37, %v893_v30 }
  0xe9   :  { %v248_v41 = vmax.f32 %v186_v35, 0.0  ;;  %v189_v42 = vadd.f32 %v893_v30, %v188_v39  ;;  %v221_v63 = vadd.f32 %v893_v30, %v220_v40  ;;  %v256_v1 = vmax.f32 %v218_v60, 0.0 }
  0xea   :  { %v251_v51 = vmax.f32 %v197_v43, 0.0  ;;  %v259_v10 = vmax.f32 %v229_v6, 0.0 }
  0xeb   :  { %v249_v44 = vmax.f32 %v189_v42, 0.0  ;;  %1067 = vmatprep.mubr.msk.f32.mxu0 %vm500_vm1, %v248_v41  ;;  %v257_v3 = vmax.f32 %v221_v63, 0.0 }
  0xed   :  { %v1025_v46 = vpop.f32.mrb[4].mxu0  ;;  %1068 = vmatmul.mubr.msk.f32.vlgmr.msra.gmra.mrb[8].mxu0 %vm500_vm1, %v249_v44  ;;  %v1033_v47 = vpop.f32.mrb[4].mxu1 }
  0xee   :  { %v210_v48 = vadd.f32 %v1025_v46, %v893_v30  ;;  %v201_v49 = vpop.f32.mrb[5].mxu0  ;;  %1070 = vmatprep.mubr.msk.f32.mxu0 %vm500_vm1, %v250_v45  ;;  %v233_v50 = vpop.f32.mrb[5].mxu1  ;;  %v242_v8 = vadd.f32 %v1033_v47, %v893_v30 }
  0xef   :  { %v202_v52 = vadd.f32 %v893_v30, %v201_v49  ;;  %v1026_v53 = vpop.f32.mrb[6].mxu0  ;;  %v1034_v54 = vpop.f32.mrb[6].mxu1  ;;  %v234_v5 = vadd.f32 %v893_v30, %v233_v50 }
  0xf0   :  { %v204_v55 = vpop.f32.mrb[7].mxu0  ;;  %v236_v56 = vpop.f32.mrb[7].mxu1  ;;  %v254_v59 = vmax.f32 %v210_v48, 0.0  ;;  %v213_v61 = vadd.f32 %v1026_v53, %v893_v30  ;;  %v262_v12 = vmax.f32 %v242_v8, 0.0  ;;  %v245_v13 = vadd.f32 %v1034_v54, %v893_v30 }
  0xf1   :  { %v252_v57 = vmax.f32 %v202_v52, 0.0  ;;  %v205_v58 = vadd.f32 %v893_v30, %v204_v55  ;;  %1071 = vmatmul.mubr.msk.f32.gmra.mrb[10].mxu0 %vm500_vm1, %v251_v51  ;;  %v237_v7 = vadd.f32 %v893_v30, %v236_v56  ;;  %v260_v9 = vmax.f32 %v234_v5, 0.0 }
  0xf2   :  { %v255_v2 = vmax.f32 %v213_v61, 0.0  ;;  %v263_v14 = vmax.f32 %v245_v13, 0.0 }
  0xf3   :  { %v253_v62 = vmax.f32 %v205_v58, 0.0  ;;  %1073 = vmatprep.mubr.msk.f32.mxu0 %vm500_vm1, %v252_v57  ;;  %v261_v11 = vmax.f32 %v237_v7, 0.0 }
  0xf5   :  { %1074 = vmatmul.mubr.msk.f32.gmra.mrb[12].mxu0 %vm500_vm1, %v253_v62 }
  0xf6   :  { %1076 = vmatprep.mubr.msk.f32.mxu0 %vm500_vm1, %v254_v59  ;;  %v1045_v15 = vpop.f32.mrb[8].mxu1 }
  0xf7   :  { %v417_v16 = vpop.f32.mrb[9].mxu1  ;;  %v426_v37 = vadd.f32 %v1045_v15, %v1366_v31 }
  0xf8   :  { %v1046_v17 = vpop.f32.mrb[10].mxu1  ;;  %v418_v33 = vadd.f32 %v1366_v31, %v417_v16 }
  0xf9   :  { %1077 = vmatmul.mubr.msk.f32.gmra.mrb[14].mxu0 %vm500_vm1, %v255_v2  ;;  %v420_v18 = vpop.f32.mrb[11].mxu1  ;;  %v429_v36 = vadd.f32 %v1046_v17, %v1366_v31  ;;  %v482_v46 = vmax.f32 %v426_v37, 0.0 }
  0xfa   :  { %1079 = vmatprep.mubr.msk.f32.mxu0 %vm500_vm1, %v256_v1  ;;  %v421_v32 = vadd.f32 %v1366_v31, %v420_v18  ;;  %v480_v35 = vmax.f32 %v418_v33, 0.0 }
  0xfb   :  { %v483_v44 = vmax.f32 %v429_v36, 0.0 }
  0xfc   :  { %v481_v34 = vmax.f32 %v421_v32, 0.0 }
  0xfd   :  { %1080 = vmatmul.mubr.msk.f32.gmra.mrb[16].mxu0 %vm500_vm1, %v257_v3 }
  0xfe   :  { %1082 = vmatprep.mubr.msk.f32.mxu0 %vm500_vm1, %v258_v4  ;;  %v1049_v19 = vpop.f32.mrb[12].mxu1 }
  0xff   :  { %v433_v20 = vpop.f32.mrb[13].mxu1  ;;  %v442_v56 = vadd.f32 %v1049_v19, %v1366_v31 }
 0x100   :  { %v1050_v21 = vpop.f32.mrb[14].mxu1  ;;  %v434_v43 = vadd.f32 %v1366_v31, %v433_v20 }
 0x101   :  { %1083 = vmatmul.mubr.msk.f32.gmra.mrb[18].mxu0 %vm500_vm1, %v259_v10  ;;  %v436_v22 = vpop.f32.mrb[15].mxu1  ;;  %v445_v53 = vadd.f32 %v1050_v21, %v1366_v31  ;;  %v486_v1 = vmax.f32 %v442_v56, 0.0 }
 0x102   :  { %1085 = vmatprep.mubr.msk.f32.mxu0 %vm500_vm1, %v260_v9  ;;  %v437_v41 = vadd.f32 %v1366_v31, %v436_v22  ;;  %v484_v51 = vmax.f32 %v434_v43, 0.0 }
 0x103   :  { %v487_v63 = vmax.f32 %v445_v53, 0.0 }
 0x104   :  { %v485_v48 = vmax.f32 %v437_v41, 0.0 }
 0x105   :  { %1086 = vmatmul.mubr.msk.f32.gmra.mrb[20].mxu0 %vm500_vm1, %v261_v11 }
 0x106   :  { %1088 = vmatprep.mubr.msk.f32.mxu0 %vm500_vm1, %v262_v12  ;;  %v1053_v23 = vpop.f32.mrb[16].mxu1 }
 0x107   :  { %v449_v24 = vpop.f32.mrb[17].mxu1  ;;  %v458_v11 = vadd.f32 %v1053_v23, %v1366_v31 }
 0x108   :  { %v1054_v25 = vpop.f32.mrb[18].mxu1  ;;  %v450_v62 = vadd.f32 %v1366_v31, %v449_v24 }
 0x109   :  { %1089 = vmatmul.mubr.msk.f32.gmra.mrb[22].mxu0 %vm500_vm1, %v263_v14  ;;  %v452_v26 = vpop.f32.mrb[19].mxu1  ;;  %v461_v9 = vadd.f32 %v1054_v25, %v1366_v31  ;;  %v490_v21 = vmax.f32 %v458_v11, 0.0 }
 0x10a   :  { %v453_v60 = vadd.f32 %v1366_v31, %v452_v26  ;;  %v488_v7 = vmax.f32 %v450_v62, 0.0 }
 0x10b   :  { %v491_v19 = vmax.f32 %v461_v9, 0.0 }
 0x10c   :  { %v489_v4 = vmax.f32 %v453_v60, 0.0 }
 0x10e   :  { %v1359_v27 = vpop.f32.mrb[20].mxu1 }
 0x10f   :  { %v465_v28 = vpop.f32.mrb[21].mxu1 }
 0x110   :  { %v1361_v29 = vpop.f32.mrb[22].mxu1  ;;  %v466_v18 = vadd.f32 %v1366_v31, %v465_v28  ;;  %v474_v28 = vadd.f32 %v1359_v27, %v1366_v31 }
 0x111   :  { %v468_v30 = vpop.f32.mrb[23].mxu1 }
 0x112   :  { %v469_v16 = vadd.f32 %v1366_v31, %v468_v30  ;;  %v492_v32 = vmax.f32 %v466_v18, 0.0  ;;  %v477_v30 = vadd.f32 %v1361_v29, %v1366_v31 }
 0x114   :  { %v493_v24 = vmax.f32 %v469_v16, 0.0 }
 0x1c0   :  { %v1069_v38 = vpop.f32.mrb[8].mxu0 }
 0x1c1   :  { %v695_v39 = vmul.f32 %v1069_v38, %v481_v34  ;;  %v615_v40 = vpop.f32.mrb[9].mxu0 }
 0x1c2   :  { %v694_v42 = vmul.f32 %v615_v40, %v480_v35  ;;  %v495_v40 = vmax.f32 %v477_v30, 0.0 }
 0x1c3   :  { %v713_v45 = vsel %vm500_vm1, %v695_v39, 0.0 }
 0x1c4   :  { %714 = vadd.xlane.f32.xlu0 %v713_v45  ;;  %v1072_v47 = vpop.f32.mrb[10].mxu0  ;;  %v710_v54 = vsel %vm500_vm1, %v694_v42, 0.0  ;;  %v494_v42 = vmax.f32 %v474_v28, 0.0 }
 0x1c5   :  { %v697_v49 = vmul.f32 %v1072_v47, %v483_v44  ;;  %v625_v50 = vpop.f32.mrb[11].mxu0 }
 0x1c6   :  { %v696_v52 = vmul.f32 %v625_v50, %v482_v46 }
 0x1c7   :  { %v719_v55 = vsel %vm500_vm1, %v697_v49, 0.0 }
 0x1c8   :  { %711 = vadd.xlane.f32.xlu0 %v710_v54  ;;  %720 = vadd.xlane.f32.xlu1 %v719_v55  ;;  %v1075_v57 = vpop.f32.mrb[12].mxu0  ;;  %v716_v0 = vsel %vm500_vm1, %v696_v52, 0.0 }
 0x1c9   :  { %v699_v58 = vmul.f32 %v1075_v57, %v485_v48  ;;  %v635_v59 = vpop.f32.mrb[13].mxu0  ;;  %v1405_v48 = vstv %s1494_s7 }
 0x1ca   :  { %v698_v61 = vmul.f32 %v635_v59, %v484_v51 }
 0x1cb   :  { %v725_v10 = vsel %vm500_vm1, %v699_v58, 0.0 }
 0x1cc   :  { %717 = vadd.xlane.f32.xlu1 %v716_v0  ;;  %v1078_v2 = vpop.f32.mrb[14].mxu0  ;;  %v722_v3 = vsel %vm500_vm1, %v698_v61, 0.0 }
 0x1cd   :  { %v701_v5 = vmul.f32 %v1078_v2, %v487_v63  ;;  %723 = vadd.xlane.f32.xlu0 %v722_v3  ;;  %v645_v6 = vpop.f32.mrb[15].mxu0 }
 0x1ce   :  { %v700_v8 = vmul.f32 %v645_v6, %v486_v1 }
 0x1cf   :  { %v731_v20 = vsel %vm500_vm1, %v701_v5, 0.0 }
 0x1d0   :  { %726 = vadd.xlane.f32.xlu1 %v725_v10  ;;  %v1081_v12 = vpop.f32.mrb[16].mxu0  ;;  %v728_v13 = vsel %vm500_vm1, %v700_v8, 0.0 }
 0x1d1   :  { %v703_v14 = vmul.f32 %v1081_v12, %v489_v4  ;;  %729 = vadd.xlane.f32.xlu0 %v728_v13  ;;  %v655_v15 = vpop.f32.mrb[17].mxu0 }
 0x1d2   :  { %v702_v17 = vmul.f32 %v655_v15, %v488_v7 }
 0x1d3   :  { %v737_v34 = vsel %vm500_vm1, %v703_v14, 0.0 }
 0x1d4   :  { %732 = vadd.xlane.f32.xlu1 %v731_v20  ;;  %v1084_v22 = vpop.f32.mrb[18].mxu0  ;;  %v734_v23 = vsel %vm500_vm1, %v702_v17, 0.0 }
 0x1d5   :  { %v705_v25 = vmul.f32 %v1084_v22, %v491_v19  ;;  %735 = vadd.xlane.f32.xlu0 %v734_v23  ;;  %v665_v26 = vpop.f32.mrb[19].mxu0 }
 0x1d6   :  { %v704_v33 = vmul.f32 %v665_v26, %v490_v21 }
 0x1d7   :  { %v743_v41 = vsel %vm500_vm1, %v705_v25, 0.0 }
 0x1d8   :  { %738 = vadd.xlane.f32.xlu1 %v737_v34  ;;  %v1087_v35 = vpop.f32.mrb[20].mxu0  ;;  %v740_v36 = vsel %vm500_vm1, %v704_v33, 0.0 }
 0x1d9   :  { %v707_v37 = vmul.f32 %v1087_v35, %v493_v24  ;;  %741 = vadd.xlane.f32.xlu0 %v740_v36  ;;  %v675_v38 = vpop.f32.mrb[21].mxu0 }
 0x1da   :  { %v706_v39 = vmul.f32 %v675_v38, %v492_v32 }
 0x1db   :  { %v749_v31 = vsel %vm500_vm1, %v707_v37, 0.0 }
 0x1dc   :  { %744 = vadd.xlane.f32.xlu1 %v743_v41  ;;  %v1090_v43 = vpop.f32.mrb[22].mxu0  ;;  %v746_v29 = vsel %vm500_vm1, %v706_v39, 0.0 }
 0x1dd   :  { %v709_v44 = vmul.f32 %v1090_v43, %v495_v40  ;;  %747 = vadd.xlane.f32.xlu0 %v746_v29  ;;  %v685_v45 = vpop.f32.mrb[23].mxu0 }
 0x1de   :  { %v708_v27 = vmul.f32 %v685_v45, %v494_v42 }
 0x1df   :  { %v755_v47 = vsel %vm500_vm1, %v709_v44, 0.0 }
 0x1e0   :  { %750 = vadd.xlane.f32.xlu1 %v749_v31  ;;  %v752_v46 = vsel %vm500_vm1, %v708_v27, 0.0 }
 0x1e1   :  { %753 = vadd.xlane.f32.xlu0 %v752_v46 }
 0x1e4   :  { %756 = vadd.xlane.f32.xlu1 %v755_v47 }
 0x251   :  { %v715_v49 = vpop.xlane.xlu0 %714 }
 0x252   :  { %v761_v50 = vadd.f32 %v1405_v48, %v715_v49 }
 0x254   :  { %v952_v51 = vmul.f32 -1.442695, %v761_v50 }
 0x255   :  { %v712_v52 = vpop.xlane.xlu0 %711  ;;  %v721_v53 = vpop.xlane.xlu1 %720 }
 0x256   :  { %1131 = vpow2.f32 %v952_v51  ;;  %v760_v54 = vadd.f32 %v1405_v48, %v712_v52  ;;  %v763_v55 = vadd.f32 %v1405_v48, %v721_v53 }
 0x258   :  { %v951_v56 = vmul.f32 -1.442695, %v760_v54  ;;  %v954_v57 = vmul.f32 -1.442695, %v763_v55 }
 0x259   :  { %v718_v58 = vpop.xlane.xlu1 %717 }
 0x25a   :  { %1133 = vpow2.f32 %v951_v56  ;;  %v762_v59 = vadd.f32 %v1405_v48, %v718_v58  ;;  %v724_v60 = vpop.xlane.xlu0 %723 }
 0x25b   :  { %1135 = vpow2.f32 %v954_v57  ;;  %v764_v61 = vadd.f32 %v1405_v48, %v724_v60 }
 0x25c   :  { %v953_v62 = vmul.f32 -1.442695, %v762_v59 }
 0x25d   :  { %v955_v63 = vmul.f32 -1.442695, %v764_v61  ;;  %v727_v0 = vpop.xlane.xlu1 %726 }
 0x25e   :  { %1137 = vpow2.f32 %v953_v62  ;;  %v765_v1 = vadd.f32 %v1405_v48, %v727_v0  ;;  %v730_v2 = vpop.xlane.xlu0 %729 }
 0x25f   :  { %1139 = vpow2.f32 %v955_v63  ;;  %v766_v3 = vadd.f32 %v1405_v48, %v730_v2 }
 0x260   :  { %v1132_v4 = vpop.eup %1131  ;;  %v956_v5 = vmul.f32 -1.442695, %v765_v1 }
 0x261   :  { %v825_v6 = vadd.f32 1.0, %v1132_v4  ;;  %v957_v7 = vmul.f32 -1.442695, %v766_v3  ;;  %v733_v8 = vpop.xlane.xlu1 %732 }
 0x262   :  { %1141 = vpow2.f32 %v956_v5  ;;  %v767_v9 = vadd.f32 %v1405_v48, %v733_v8  ;;  %v736_v10 = vpop.xlane.xlu0 %735 }
 0x263   :  { %1143 = vrcp.f32 %v825_v6  ;;  %v768_v11 = vadd.f32 %v1405_v48, %v736_v10 }
 0x264   :  { %v1134_v12 = vpop.eup %1133  ;;  %1145 = vpow2.f32 %v957_v7  ;;  %v958_v13 = vmul.f32 -1.442695, %v767_v9 }
 0x265   :  { %v1136_v14 = vpop.eup %1135  ;;  %v824_v15 = vadd.f32 1.0, %v1134_v12  ;;  %v959_v16 = vmul.f32 -1.442695, %v768_v11  ;;  %v739_v17 = vpop.xlane.xlu1 %738 }
 0x266   :  { %v827_v18 = vadd.f32 1.0, %v1136_v14  ;;  %1147 = vpow2.f32 %v958_v13  ;;  %v769_v19 = vadd.f32 %v1405_v48, %v739_v17  ;;  %v742_v20 = vpop.xlane.xlu0 %741 }
 0x267   :  { %1149 = vrcp.f32 %v824_v15  ;;  %v770_v21 = vadd.f32 %v1405_v48, %v742_v20 }
 0x268   :  { %v1138_v22 = vpop.eup %1137  ;;  %1151 = vrcp.f32 %v827_v18  ;;  %v960_v23 = vmul.f32 -1.442695, %v769_v19 }
 0x269   :  { %v1140_v24 = vpop.eup %1139  ;;  %v826_v25 = vadd.f32 1.0, %v1138_v22  ;;  %1153 = vpow2.f32 %v959_v16  ;;  %v961_v26 = vmul.f32 -1.442695, %v770_v21  ;;  %v745_v32 = vpop.xlane.xlu1 %744 }
 0x26a   :  { %v828_v33 = vadd.f32 1.0, %v1140_v24  ;;  %1155 = vpow2.f32 %v960_v23  ;;  %v771_v30 = vadd.f32 %v1405_v48, %v745_v32  ;;  %v748_v34 = vpop.xlane.xlu0 %747 }
 0x26b   :  { %1157 = vrcp.f32 %v826_v25  ;;  %v772_v28 = vadd.f32 %v1405_v48, %v748_v34 }
 0x26c   :  { %v1142_v35 = vpop.eup %1141  ;;  %1159 = vrcp.f32 %v828_v33  ;;  %v962_v36 = vmul.f32 -1.442695, %v771_v30 }
 0x26d   :  { %v1144_v37 = vpop.eup %1143  ;;  %v829_v38 = vadd.f32 1.0, %v1142_v35  ;;  %1161 = vpow2.f32 %v961_v26  ;;  %v963_v39 = vmul.f32 -1.442695, %v772_v28  ;;  %v751_v40 = vpop.xlane.xlu1 %750 }
 0x26e   :  { %v1146_v41 = vpop.eup %1145  ;;  %874 = vst.msk [vmem:[%s1495_s8 + $0x8] sm:$0xff] %vm872_vm2, %v1144_v37  ;;  %1163 = vpow2.f32 %v962_v36  ;;  %v773_v42 = vadd.f32 %v1405_v48, %v751_v40  ;;  %v754_v43 = vpop.xlane.xlu0 %753 }
 0x26f   :  { %1165 = vrcp.f32 %v829_v38  ;;  %v830_v29 = vadd.f32 1.0, %v1146_v41  ;;  %v774_v44 = vadd.f32 %v1405_v48, %v754_v43 }
 0x270   :  { %v1148_v45 = vpop.eup %1147  ;;  %1167 = vpow2.f32 %v963_v39  ;;  %v964_v27 = vmul.f32 -1.442695, %v773_v42 }
 0x271   :  { %v1150_v31 = vpop.eup %1149  ;;  %1169 = vrcp.f32 %v830_v29  ;;  %v831_v46 = vadd.f32 1.0, %v1148_v45  ;;  %v965_v47 = vmul.f32 -1.442695, %v774_v44  ;;  %v757_v49 = vpop.xlane.xlu1 %756 }
 0x272   :  { %v1152_v50 = vpop.eup %1151  ;;  %873 = vst.msk [vmem:[%s1495_s8] sm:$0xff] %vm872_vm2, %v1150_v31  ;;  %1171 = vpow2.f32 %v964_v27  ;;  %v775_v51 = vadd.f32 %v1405_v48, %v757_v49 }
 0x273   :  { %v1154_v52 = vpop.eup %1153  ;;  %876 = vst.msk [vmem:[%s1495_s8 + $0x18] sm:$0xff] %vm872_vm2, %v1152_v50  ;;  %1173 = vrcp.f32 %v831_v46 }
 0x274   :  { %v1156_v53 = vpop.eup %1155  ;;  %v832_v54 = vadd.f32 1.0, %v1154_v52  ;;  %1175 = vpow2.f32 %v965_v47  ;;  %v966_v55 = vmul.f32 -1.442695, %v775_v51 }
 0x275   :  { %v1158_v56 = vpop.eup %1157  ;;  %v833_v57 = vadd.f32 1.0, %v1156_v53 }
 0x276   :  { %v1160_v58 = vpop.eup %1159  ;;  %875 = vst.msk [vmem:[%s1495_s8 + $0x10] sm:$0xff] %vm872_vm2, %v1158_v56  ;;  %1177 = vrcp.f32 %v832_v54 }
 0x277   :  { %v1162_v48 = vpop.eup %1161  ;;  %877 = vst.msk [vmem:[%s1495_s8 + $0x20] sm:$0xff] %vm872_vm2, %v1160_v58  ;;  %1179 = vrcp.f32 %v833_v57 }
 0x278   :  { %v1164_v59 = vpop.eup %1163  ;;  %v834_v60 = vadd.f32 1.0, %v1162_v48  ;;  %1181 = vpow2.f32 %v966_v55 }
 0x279   :  { %v1166_v61 = vpop.eup %1165  ;;  %v835_v62 = vadd.f32 1.0, %v1164_v59 }
 0x27a   :  { %v1168_v63 = vpop.eup %1167  ;;  %878 = vst.msk [vmem:[%s1495_s8 + $0x28] sm:$0xff] %vm872_vm2, %v1166_v61  ;;  %1183 = vrcp.f32 %v834_v60 }
 0x27b   :  { %v1170_v0 = vpop.eup %1169  ;;  %1185 = vrcp.f32 %v835_v62  ;;  %v836_v1 = vadd.f32 1.0, %v1168_v63 }
 0x27c   :  { %v1172_v2 = vpop.eup %1171  ;;  %879 = vst.msk [vmem:[%s1495_s8 + $0x30] sm:$0xff] %vm872_vm2, %v1170_v0 }
 0x27d   :  { %v1174_v3 = vpop.eup %1173  ;;  %1187 = vrcp.f32 %v836_v1  ;;  %v837_v4 = vadd.f32 1.0, %v1172_v2 }
 0x27e   :  { %v1176_v5 = vpop.eup %1175  ;;  %880 = vst.msk [vmem:[%s1495_s8 + $0x38] sm:$0xff] %vm872_vm2, %v1174_v3 }
 0x27f   :  { %1189 = vrcp.f32 %v837_v4  ;;  %v838_v6 = vadd.f32 1.0, %v1176_v5 }
 0x280   :  { %v1178_v7 = vpop.eup %1177 }
 0x281   :  { %v1180_v8 = vpop.eup %1179  ;;  %881 = vst.msk [vmem:[%s1495_s8 + $0x40] sm:$0xff] %vm872_vm2, %v1178_v7  ;;  %1191 = vrcp.f32 %v838_v6 }
 0x282   :  { %v1182_v9 = vpop.eup %1181  ;;  %882 = vst.msk [vmem:[%s1495_s8 + $0x48] sm:$0xff] %vm872_vm2, %v1180_v8 }
 0x283   :  { %v839_v10 = vadd.f32 1.0, %v1182_v9 }
 0x284   :  { %v1184_v11 = vpop.eup %1183 }
 0x285   :  { %v1186_v12 = vpop.eup %1185  ;;  %883 = vst.msk [vmem:[%s1495_s8 + $0x50] sm:$0xff] %vm872_vm2, %v1184_v11  ;;  %1193 = vrcp.f32 %v839_v10 }
 0x286   :  { %884 = vst.msk [vmem:[%s1495_s8 + $0x58] sm:$0xff] %vm872_vm2, %v1186_v12 }
 0x287   :  { %v1188_v13 = vpop.eup %1187 }
 0x288   :  { %885 = vst.msk [vmem:[%s1495_s8 + $0x60] sm:$0xff] %vm872_vm2, %v1188_v13 }
 0x289   :  { %v1190_v14 = vpop.eup %1189 }
 0x28a   :  { %886 = vst.msk [vmem:[%s1495_s8 + $0x68] sm:$0xff] %vm872_vm2, %v1190_v14 }
 0x28b   :  { %v1192_v15 = vpop.eup %1191 }
 0x28c   :  { %887 = vst.msk [vmem:[%s1495_s8 + $0x70] sm:$0xff] %vm872_vm2, %v1192_v15 }
 0x28f   :  { %v1194_v16 = vpop.eup %1193 }
 0x290   :  { %888 = vst.msk [vmem:[%s1495_s8 + $0x78] sm:$0xff] %vm872_vm2, %v1194_v16 }

</bundles_post_ra>
